<compile_context>
chip_gen: v7x
topology: tpu7x:2x2x1
jax: 0.10.0
libtpu: 0.0.40
codegen_flags: <defaults>
</compile_context>

<pallas_src>
import numpy as np
import jax
import jax.numpy as jnp
from jax.experimental import pallas as pl
from jax.experimental.pallas import tpu as pltpu

_SQRT_HALF_PI = float(np.sqrt(np.pi / 2.0))
_EPS = 1e-7

_MAX_ROW_TILE = 256                    # sublane-dim tile cap (rows)
_MAX_LANE_TILE = 4096                  # lane-dim tile cap (128-aligned)
_STREAM_VMEM_LIMIT = 32 * 1024 * 1024  # streaming passes stay well under this
_FUSED_VMEM_LIMIT = 48 * 1024 * 1024   # safe on v5e/v6e (128 MiB) and v7x (64 MiB)
_FUSED_X_F32_BYTES_MAX = 4 * 1024 * 1024  # resident-x threshold (conservative)


# --------------------------------------------------------------------------
# tile pickers
# --------------------------------------------------------------------------
def _pick_row_tile(num_rows, itemsize, max_rows=_MAX_ROW_TILE):
    """Row (sublane) tile: dtype-aware multiple dividing R, else full dim.

    Splits to >=2 row-grid steps when possible so both v7x TensorCores get
    work on the 'parallel' axis.
    """
    sub = {1: 32, 2: 16}.get(int(itemsize), 8)
    if num_rows % sub != 0:
        return num_rows                      # full-extent block (always legal)
    limit = min(max_rows, num_rows)
    limit -= limit % sub
    tr = sub
    for cand in range(limit, sub - 1, -sub):
        if num_rows % cand == 0:
            tr = cand
            break
    # guarantee >= 2 steps on the parallel row axis when R allows it
    if tr == num_rows and num_rows >= 2 * sub and (num_rows // 2) % sub == 0:
        tr = num_rows // 2
    return tr


def _pick_lane_tile(hw, max_lanes=_MAX_LANE_TILE):
    """Lane tile. Returns (tm, need_mask).

    Prefers (a) the full row (single tile) or (b) an exact 128-aligned divisor
    of HW, so no per-element masking is needed.  The masked fallback is only
    hit for HW > max_lanes that is not a multiple of 128 (rare).
    """
    if hw <= max_lanes:
        return hw, False                     # single full-extent lane tile
    if hw % 128 == 0:
        limit = max_lanes - (max_lanes % 128)
        for cand in range(limit, 127, -128):
            if hw % cand == 0:
                return cand, False           # exact divisor -> no mask
    tm = max_lanes - (max_lanes % 128)
    return tm, (hw % tm != 0)


# --------------------------------------------------------------------------
# streaming kernels (x too big to keep resident in VMEM)
# --------------------------------------------------------------------------
def _make_row_sum_kernel(hw, tm, acc_w, need_mask):
    """Pass 1: accumulate lane-dense (tr, acc_w) partial row sums over HW."""
    n_slabs = tm // acc_w if acc_w == 128 else 1

    def _accumulate(vals, acc_ref):
        if acc_w == 1:
            acc_ref[...] += jnp.sum(vals, axis=1, keepdims=True)
        else:
            part = vals[:, 0:acc_w]
            for s in range(1, n_slabs):           # static slices: VALU adds only
                part = part + vals[:, s * acc_w:(s + 1) * acc_w]
            acc_ref[...] += part

    def kernel(x_ref, acc_ref):
        gm = pl.program_id(1)

        @pl.when(gm == 0)
        def _init():
            acc_ref[...] = jnp.zeros_like(acc_ref)

        if need_mask:
            is_last = gm == pl.num_programs(1) - 1

            @pl.when(jnp.logical_not(is_last))
            def _full_tile():
                _accumulate(x_ref[...].astype(jnp.float32), acc_ref)

            @pl.when(is_last)
            def _partial_tile():
                x = x_ref[...].astype(jnp.float32)
                lane = jax.lax.broadcasted_iota(jnp.int32, x.shape, 1)
                valid = hw - gm * tm
                _accumulate(jnp.where(lane < valid, x, 0.0), acc_ref)
        else:
            _accumulate(x_ref[...].astype(jnp.float32), acc_ref)

    return kernel


def _make_absdev_kernel(hw, tm, acc_w, need_mask):
    """Pass 2: accumulate lane-dense (tr, acc_w) partial sums of |x - mean|."""
    n_slabs = tm // acc_w if acc_w == 128 else 1

    def _accumulate(dev, acc_ref):
        if acc_w == 1:
            acc_ref[...] += jnp.sum(dev, axis=1, keepdims=True)
        else:
            part = dev[:, 0:acc_w]
            for s in range(1, n_slabs):
                part = part + dev[:, s * acc_w:(s + 1) * acc_w]
            acc_ref[...] += part

    def kernel(x_ref, mu_ref, acc_ref):
        gm = pl.program_id(1)

        @pl.when(gm == 0)
        def _init():
            acc_ref[...] = jnp.zeros_like(acc_ref)

        mu = mu_ref[...]                               # (tr, 1) f32

        if need_mask:
            is_last = gm == pl.num_programs(1) - 1

            @pl.when(jnp.logical_not(is_last))
            def _full_tile():
                _accumulate(jnp.abs(x_ref[...].astype(jnp.float32) - mu), acc_ref)

            @pl.when(is_last)
            def _partial_tile():
                d = jnp.abs(x_ref[...].astype(jnp.float32) - mu)
                lane = jax.lax.broadcasted_iota(jnp.int32, d.shape, 1)
                valid = hw - gm * tm
                _accumulate(jnp.where(lane < valid, d, 0.0), acc_ref)
        else:
            _accumulate(jnp.abs(x_ref[...].astype(jnp.float32) - mu), acc_ref)

    return kernel


def _affine_kernel(x_ref, a_ref, b_ref, o_ref):
    """Pass 3: single fused per-channel FMA, out = x * alpha + beta."""
    x = x_ref[...].astype(jnp.float32)
    o_ref[...] = (x * a_ref[...] + b_ref[...]).astype(o_ref.dtype)


def _streamed_row_sums(x2, tr, tm, hw, acc_w, need_mask):
    R = x2.shape[0]
    grid = (pl.cdiv(R, tr), pl.cdiv(hw, tm))
    acc = pl.pallas_call(
        _make_row_sum_kernel(hw, tm, acc_w, need_mask),
        out_shape=jax.ShapeDtypeStruct((R, acc_w), jnp.float32),
        grid=grid,
        in_specs=[pl.BlockSpec((tr, tm), lambda r, m: (r, m))],
        out_specs=pl.BlockSpec((tr, acc_w), lambda r, m: (r, 0)),
        compiler_params=pltpu.CompilerParams(
            dimension_semantics=("parallel", "arbitrary"),
            vmem_limit_bytes=_STREAM_VMEM_LIMIT),
    )(x2)
    return acc.sum(axis=1)                             # (R,) tiny host glue


def _streamed_absdev_sums(x2, mu_row, tr, tm, hw, acc_w, need_mask):
    R = x2.shape[0]
    grid = (pl.cdiv(R, tr), pl.cdiv(hw, tm))
    acc = pl.pallas_call(
        _make_absdev_kernel(hw, tm, acc_w, need_mask),
        out_shape=jax.ShapeDtypeStruct((R, acc_w), jnp.float32),
        grid=grid,
        in_specs=[pl.BlockSpec((tr, tm), lambda r, m: (r, m)),
                  pl.BlockSpec((tr, 1), lambda r, m: (r, 0))],
        out_specs=pl.BlockSpec((tr, acc_w), lambda r, m: (r, 0)),
        compiler_params=pltpu.CompilerParams(
            dimension_semantics=("parallel", "arbitrary"),
            vmem_limit_bytes=_STREAM_VMEM_LIMIT),
    )(x2, mu_row)
    return acc.sum(axis=1)


def _streamed_affine(x2, alpha_row, beta_row, tr, tm, hw):
    R = x2.shape[0]
    grid = (pl.cdiv(R, tr), pl.cdiv(hw, tm))
    return pl.pallas_call(
        _affine_kernel,
        out_shape=jax.ShapeDtypeStruct(x2.shape, x2.dtype),
        grid=grid,
        in_specs=[pl.BlockSpec((tr, tm), lambda r, m: (r, m)),
                  pl.BlockSpec((tr, 1), lambda r, m: (r, 0)),
                  pl.BlockSpec((tr, 1), lambda r, m: (r, 0))],
        out_specs=pl.BlockSpec((tr, tm), lambda r, m: (r, m)),
        compiler_params=pltpu.CompilerParams(
            dimension_semantics=("parallel", "parallel"),
            vmem_limit_bytes=_STREAM_VMEM_LIMIT),
    )(x2, alpha_row, beta_row)


# --------------------------------------------------------------------------
# fused single-call kernel (x resident in VMEM): 1 HBM read + 1 write
# --------------------------------------------------------------------------
def _make_fused_kernel(n, c, hw):
    inv_count = 1.0 / float(n * hw)

    def kernel(x_ref, ws_ref, wm_ref, o_ref, mean_ref, scale_ref):
        x = x_ref[...].astype(jnp.float32)                       # (N, C, HW)
        s = jnp.sum(jnp.sum(x, axis=2, keepdims=True), axis=0, keepdims=True)
        mean = s * inv_count                                     # (1, C, 1)
        d = jnp.abs(x - mean)
        v = jnp.sum(jnp.sum(d, axis=2, keepdims=True), axis=0, keepdims=True)
        var = v * inv_count                                      # (1, C, 1)
        scale = 1.0 / (var * _SQRT_HALF_PI + _EPS)               # (1, C, 1)
        alpha = scale * ws_ref[...]
        beta = wm_ref[...] - mean * alpha
        o_ref[...] = (x * alpha + beta).astype(o_ref.dtype)
        mean_ref[...] = mean
        scale_ref[...] = scale

    return kernel


def _fused_forward(x3, weight_scale, weight_mean):
    N, C, HW = x3.shape
    ws = weight_scale.astype(jnp.float32).reshape(1, C, 1)
    wm = weight_mean.astype(jnp.float32).reshape(1, C, 1)
    out3, mean3, scale3 = pl.pallas_call(
        _make_fused_kernel(N, C, HW),
        out_shape=(jax.ShapeDtypeStruct((N, C, HW), x3.dtype),
                   jax.ShapeDtypeStruct((1, C, 1), jnp.float32),
                   jax.ShapeDtypeStruct((1, C, 1), jnp.float32)),
        grid=(1,),
        in_specs=[pl.BlockSpec((N, C, HW), lambda i: (0, 0, 0)),
                  pl.BlockSpec((1, C, 1), lambda i: (0, 0, 0)),
                  pl.BlockSpec((1, C, 1), lambda i: (0, 0, 0))],
        out_specs=(pl.BlockSpec((N, C, HW), lambda i: (0, 0, 0)),
                   pl.BlockSpec((1, C, 1), lambda i: (0, 0, 0)),
                   pl.BlockSpec((1, C, 1), lambda i: (0, 0, 0))),
        compiler_params=pltpu.CompilerParams(
            dimension_semantics=("arbitrary",),
            vmem_limit_bytes=_FUSED_VMEM_LIMIT),
    )(x3, ws, wm)
    return out3, mean3.reshape(C), scale3.reshape(C)


# --------------------------------------------------------------------------
# public forward
# --------------------------------------------------------------------------
def quantized_l1_forward(x_nchw, weight_scale, weight_mean,
                         running_mean, running_var,
                         momentum=0.1, training=True,
                         fused_threshold_bytes=_FUSED_X_F32_BYTES_MAX):
    """QuantizedL1 forward. Returns (out, new_running_mean, new_running_var)."""
    N, C, H, W = x_nchw.shape
    HW = H * W
    R = N * C
    itemsize = jnp.dtype(x_nchw.dtype).itemsize

    # ---- fused resident-x path (training only; 1 HBM read + 1 write) ----
    if training and (R * HW * 4 <= fused_threshold_bytes):
        out3, mean_c, scale_c = _fused_forward(
            x_nchw.reshape(N, C, HW), weight_scale, weight_mean)
        out = out3.reshape(N, C, H, W)
        new_rm = running_mean * momentum + mean_c * (1.0 - momentum)
        new_rv = running_var * momentum + scale_c * (1.0 - momentum)
        return out, new_rm, new_rv

    # ---- streaming path: x viewed as (R, HW) with a FREE reshape ----
    x2 = x_nchw.reshape(R, HW)
    tr = _pick_row_tile(R, itemsize)
    tm, need_mask = _pick_lane_tile(HW)
    acc_w = 128 if (tm % 128 == 0) else 1

    if training:
        # pass 1: per-channel mean
        row_sums = _streamed_row_sums(x2, tr, tm, HW, acc_w, need_mask)
        mean_c = row_sums.reshape(N, C).sum(axis=0) / float(N * HW)
        mu_row = jnp.broadcast_to(mean_c[None, :], (N, C)).reshape(R, 1)

        # pass 2: per-channel L1 deviation -> scale
        dev_sums = _streamed_absdev_sums(
            x2, mu_row.astype(jnp.float32), tr, tm, HW, acc_w, need_mask)
        var_c = dev_sums.reshape(N, C).sum(axis=0) / float(N * HW)
        scale_c = 1.0 / (var_c * _SQRT_HALF_PI + _EPS)

        new_rm = running_mean * momentum + mean_c * (1.0 - momentum)
        new_rv = running_var * momentum + scale_c * (1.0 - momentum)
    else:
        mean_c = running_mean.astype(jnp.float32)
        scale_c = running_var.astype(jnp.float32)
        new_rm = running_mean
        new_rv = running_var

    # pass 3: out = x * alpha + beta (whole affine chain in one FMA)
    alpha_c = scale_c * weight_scale.astype(jnp.float32)
    beta_c = weight_mean.astype(jnp.float32) - mean_c * alpha_c
    alpha_row = jnp.broadcast_to(alpha_c[None, :], (N, C)).reshape(R, 1)
    beta_row = jnp.broadcast_to(beta_c[None, :], (N, C)).reshape(R, 1)
    out2 = _streamed_affine(x2,
                            alpha_row.astype(jnp.float32),
                            beta_row.astype(jnp.float32),
                            tr, tm, HW)
    out = out2.reshape(N, C, H, W)

    # TODO(synk): noise=True branch (multiplicative Gaussian noise scaled by
    # 0.1*std(x, dim)) is not implemented; module default is noise=False.
    return out, new_rm, new_rv


# --------------------------------------------------------------------------
# reference + tests
# --------------------------------------------------------------------------
def _reference_forward(x, wscale, wmean):
    """Pure-JAX replica of the PyTorch QuantizedL1 training forward."""
    N, C, H, W = x.shape
    mean = x.reshape(N, C, -1).mean(-1).mean(0)                 # (C,)
    t = jnp.transpose(x, (1, 0, 2, 3)).reshape(C, -1)           # (C, M)
    var = jnp.abs(t.T - mean[None, :]).mean(0)                  # (C,)
    scale = 1.0 / (var * _SQRT_HALF_PI + _EPS)
    out = (x - mean.reshape(1, C, 1, 1)) * scale.reshape(1, C, 1, 1)
    out = out * wscale.reshape(1, C, 1, 1) + wmean.reshape(1, C, 1, 1)
    return out


if __name__ == "__main__":
    root = jax.random.PRNGKey(0)

    def _params(shape, key):
        C = shape[1]
        kx, km, ks = jax.random.split(key, 3)
        x = jax.random.normal(kx, shape, dtype=jnp.float32) * 2.0 + 0.5
        wm = 0.1 * jax.random.normal(km, (C,), dtype=jnp.float32)
        ws = 1.0 + 0.1 * jax.random.normal(ks, (C,), dtype=jnp.float32)
        return x, ws, wm

    def _check_train(shape, key, fused_threshold):
        C = shape[1]
        x, ws, wm = _params(shape, key)
        rm = jnp.zeros((C,), jnp.float32)
        rv = jnp.zeros((C,), jnp.float32)
        out, _, _ = quantized_l1_forward(
            x, ws, wm, rm, rv, training=True,
            fused_threshold_bytes=fused_threshold)
        out = jax.block_until_ready(out)
        ref = _reference_forward(x, ws, wm)
        np.testing.assert_allclose(np.asarray(out), np.asarray(ref),
                                   rtol=1e-5, atol=2e-5)

    def _check_eval(shape, key):
        C = shape[1]
        x, ws, wm = _params(shape, key)
        rm = 0.2 * jnp.arange(C, dtype=jnp.float32)
        rv = 1.0 + 0.05 * jnp.arange(C, dtype=jnp.float32)
        out, _, _ = quantized_l1_forward(x, ws, wm, rm, rv, training=False)
        out = jax.block_until_ready(out)
        ref = ((x - rm.reshape(1, C, 1, 1)) * rv.reshape(1, C, 1, 1)
               * ws.reshape(1, C, 1, 1) + wm.reshape(1, C, 1, 1))
        np.testing.assert_allclose(np.asarray(out), np.asarray(ref),
                                   rtol=1e-5, atol=2e-5)

    keys = jax.random.split(root, 5)
    # 1) fused resident-x path, tiny conv activation
    _check_train((2, 4, 16, 16), keys[0], _FUSED_X_F32_BYTES_MAX)
    # 2) fused path, larger spatial
    _check_train((4, 8, 48, 48), keys[1], _FUSED_X_F32_BYTES_MAX)
    # 3) streaming path (forced), exact-divisor lane tiles (6400 -> 2 x 3200),
    #    multi-step reduction with lane-dense slab accumulation
    _check_train((2, 4, 80, 80), keys[2], 0)
    # 4) streaming path (forced), masked-partial-last-tile fallback
    #    (HW=5184 not a multiple of 128, > 4096)
    _check_train((2, 4, 72, 72), keys[3], 0)
    # 5) eval path (running-stat affine only)
    _check_eval((2, 4, 16, 16), keys[4])

    print("KERNEL_OK")
</pallas_src>

<mosaic_0001>
module attributes {stable_mosaic.version = 11 : i64} {
  func.func @kernel(%arg0: i32, %arg1: memref<2x4x256xf32, #tpu.memory_space<vmem>>, %arg2: memref<1x4x1xf32, #tpu.memory_space<vmem>>, %arg3: memref<1x4x1xf32, #tpu.memory_space<vmem>>, %arg4: memref<2x4x256xf32, #tpu.memory_space<vmem>>, %arg5: memref<1x4x1xf32, #tpu.memory_space<vmem>>, %arg6: memref<1x4x1xf32, #tpu.memory_space<vmem>>) attributes {dimension_semantics = [#tpu.dimension_semantics<arbitrary>], iteration_bounds = array<i64: 1>, scalar_prefetch = 0 : i64, scratch_operands = 0 : i64, tpu.core_type = #tpu.core_type<tc>, window_params = [{pipeline_mode = #tpu.pipeline_mode<synchronous>, transform_indices = @transform_0, window_bounds = array<i64: 2, 4, 256>}, {pipeline_mode = #tpu.pipeline_mode<synchronous>, transform_indices = @transform_1, window_bounds = array<i64: 1, 4, 1>}, {pipeline_mode = #tpu.pipeline_mode<synchronous>, transform_indices = @transform_2, window_bounds = array<i64: 1, 4, 1>}, {pipeline_mode = #tpu.pipeline_mode<synchronous>, transform_indices = @transform_3, window_bounds = array<i64: 2, 4, 256>}, {pipeline_mode = #tpu.pipeline_mode<synchronous>, transform_indices = @transform_4, window_bounds = array<i64: 1, 4, 1>}, {pipeline_mode = #tpu.pipeline_mode<synchronous>, transform_indices = @transform_5, window_bounds = array<i64: 1, 4, 1>}]} {
    %c0 = arith.constant 0 : index
    %c0_0 = arith.constant 0 : index
    %c0_1 = arith.constant 0 : index
    %0 = vector.load %arg1[%c0, %c0_0, %c0_1] : memref<2x4x256xf32, #tpu.memory_space<vmem>>, vector<2x4x256xf32>
    %cst = arith.constant dense<0.000000e+00> : vector<2x4xf32>
    %1 = vector.multi_reduction <add>, %0, %cst [2] : vector<2x4x256xf32> to vector<2x4xf32>
    %2 = vector.shape_cast %1 : vector<2x4xf32> to vector<2x4x1xf32>
    %cst_2 = arith.constant dense<0.000000e+00> : vector<4x1xf32>
    %3 = vector.multi_reduction <add>, %2, %cst_2 [0] : vector<2x4x1xf32> to vector<4x1xf32>
    %4 = vector.shape_cast %3 : vector<4x1xf32> to vector<1x4x1xf32>
    %cst_3 = arith.constant 0.001953125 : f32
    %5 = vector.broadcast %cst_3 : f32 to vector<1x4x1xf32>
    %6 = arith.mulf %4, %5 : vector<1x4x1xf32>
    %7 = vector.broadcast %6 : vector<1x4x1xf32> to vector<2x4x256xf32>
    %8 = arith.subf %0, %7 : vector<2x4x256xf32>
    %9 = math.absf %8 : vector<2x4x256xf32>
    %cst_4 = arith.constant dense<0.000000e+00> : vector<2x4xf32>
    %10 = vector.multi_reduction <add>, %9, %cst_4 [2] : vector<2x4x256xf32> to vector<2x4xf32>
    %11 = vector.shape_cast %10 : vector<2x4xf32> to vector<2x4x1xf32>
    %cst_5 = arith.constant dense<0.000000e+00> : vector<4x1xf32>
    %12 = vector.multi_reduction <add>, %11, %cst_5 [0] : vector<2x4x1xf32> to vector<4x1xf32>
    %13 = vector.shape_cast %12 : vector<4x1xf32> to vector<1x4x1xf32>
    %cst_6 = arith.constant 0.001953125 : f32
    %14 = vector.broadcast %cst_6 : f32 to vector<1x4x1xf32>
    %15 = arith.mulf %13, %14 : vector<1x4x1xf32>
    %cst_7 = arith.constant 1.25331414 : f32
    %16 = vector.broadcast %cst_7 : f32 to vector<1x4x1xf32>
    %17 = arith.mulf %15, %16 : vector<1x4x1xf32>
    %cst_8 = arith.constant 1.000000e-07 : f32
    %18 = vector.broadcast %cst_8 : f32 to vector<1x4x1xf32>
    %19 = arith.addf %17, %18 : vector<1x4x1xf32>
    %cst_9 = arith.constant 1.000000e+00 : f32
    %20 = vector.broadcast %cst_9 : f32 to vector<1x4x1xf32>
    %21 = arith.divf %20, %19 : vector<1x4x1xf32>
    %c0_10 = arith.constant 0 : index
    %c0_11 = arith.constant 0 : index
    %c0_12 = arith.constant 0 : index
    %22 = vector.load %arg2[%c0_10, %c0_11, %c0_12] : memref<1x4x1xf32, #tpu.memory_space<vmem>>, vector<1x4x1xf32>
    %23 = arith.mulf %21, %22 : vector<1x4x1xf32>
    %c0_13 = arith.constant 0 : index
    %c0_14 = arith.constant 0 : index
    %c0_15 = arith.constant 0 : index
    %24 = vector.load %arg3[%c0_13, %c0_14, %c0_15] : memref<1x4x1xf32, #tpu.memory_space<vmem>>, vector<1x4x1xf32>
    %25 = arith.mulf %6, %23 : vector<1x4x1xf32>
    %26 = arith.subf %24, %25 : vector<1x4x1xf32>
    %27 = vector.broadcast %23 : vector<1x4x1xf32> to vector<2x4x256xf32>
    %28 = arith.mulf %0, %27 : vector<2x4x256xf32>
    %29 = vector.broadcast %26 : vector<1x4x1xf32> to vector<2x4x256xf32>
    %30 = arith.addf %28, %29 : vector<2x4x256xf32>
    %c0_16 = arith.constant 0 : index
    %c0_17 = arith.constant 0 : index
    %c0_18 = arith.constant 0 : index
    %31 = vector.load %arg4[%c0_16, %c0_17, %c0_18] : memref<2x4x256xf32, #tpu.memory_space<vmem>>, vector<2x4x256xf32>
    tpu.vector_store %arg4[%c0_16, %c0_17, %c0_18], %30 {strides = array<i32>} : memref<2x4x256xf32, #tpu.memory_space<vmem>>, vector<2x4x256xf32>,
    %c0_19 = arith.constant 0 : index
    %c0_20 = arith.constant 0 : index
    %c0_21 = arith.constant 0 : index
    %32 = vector.load %arg5[%c0_19, %c0_20, %c0_21] : memref<1x4x1xf32, #tpu.memory_space<vmem>>, vector<1x4x1xf32>
    tpu.vector_store %arg5[%c0_19, %c0_20, %c0_21], %6 {strides = array<i32>} : memref<1x4x1xf32, #tpu.memory_space<vmem>>, vector<1x4x1xf32>,
    %c0_22 = arith.constant 0 : index
    %c0_23 = arith.constant 0 : index
    %c0_24 = arith.constant 0 : index
    %33 = vector.load %arg6[%c0_22, %c0_23, %c0_24] : memref<1x4x1xf32, #tpu.memory_space<vmem>>, vector<1x4x1xf32>
    tpu.vector_store %arg6[%c0_22, %c0_23, %c0_24], %21 {strides = array<i32>} : memref<1x4x1xf32, #tpu.memory_space<vmem>>, vector<1x4x1xf32>,
    return
  }
  func.func @transform_0(%arg0: i32) -> (i32, i32, i32) {
    %c0_i32 = arith.constant 0 : i32
    %c0_i32_0 = arith.constant 0 : i32
    %c0_i32_1 = arith.constant 0 : i32
    %c0_i32_2 = arith.constant 0 : i32
    return %c0_i32, %c0_i32_0, %c0_i32_1 : i32, i32, i32
  }
  func.func @transform_1(%arg0: i32) -> (i32, i32, i32) {
    %c0_i32 = arith.constant 0 : i32
    %c0_i32_0 = arith.constant 0 : i32
    %c0_i32_1 = arith.constant 0 : i32
    %c0_i32_2 = arith.constant 0 : i32
    return %c0_i32, %c0_i32_0, %c0_i32_1 : i32, i32, i32
  }
  func.func @transform_2(%arg0: i32) -> (i32, i32, i32) {
    %c0_i32 = arith.constant 0 : i32
    %c0_i32_0 = arith.constant 0 : i32
    %c0_i32_1 = arith.constant 0 : i32
    %c0_i32_2 = arith.constant 0 : i32
    return %c0_i32, %c0_i32_0, %c0_i32_1 : i32, i32, i32
  }
  func.func @transform_3(%arg0: i32) -> (i32, i32, i32) {
    %c0_i32 = arith.constant 0 : i32
    %c0_i32_0 = arith.constant 0 : i32
    %c0_i32_1 = arith.constant 0 : i32
    %c0_i32_2 = arith.constant 0 : i32
    return %c0_i32, %c0_i32_0, %c0_i32_1 : i32, i32, i32
  }
  func.func @transform_4(%arg0: i32) -> (i32, i32, i32) {
    %c0_i32 = arith.constant 0 : i32
    %c0_i32_0 = arith.constant 0 : i32
    %c0_i32_1 = arith.constant 0 : i32
    %c0_i32_2 = arith.constant 0 : i32
    return %c0_i32, %c0_i32_0, %c0_i32_1 : i32, i32, i32
  }
  func.func @transform_5(%arg0: i32) -> (i32, i32, i32) {
    %c0_i32 = arith.constant 0 : i32
    %c0_i32_0 = arith.constant 0 : i32
    %c0_i32_1 = arith.constant 0 : i32
    %c0_i32_2 = arith.constant 0 : i32
    return %c0_i32, %c0_i32_0, %c0_i32_1 : i32, i32, i32
  }
}

</mosaic_0001>

<bundles_post_ra>
// kernel: tpu_custom_call.1
= control target key start
LH: loop header
LB: loop body
LE: loop exit
PB: predicated region body
PF: predicated region fallthrough
CT: control target
= control target key end

     0   :  { %11 = vsyncpa [#allocation3], 0  ;;  %s321_s0 = inlined_call_operand.hbm [shape: f32[2,4,256], index: 0, kind: input, shape index: {}]   ;;  %s322_s1 = inlined_call_operand.vmem [shape: f32[1,4,1], index: 1, kind: input, shape index: {}]   ;;  %s323_s2 = inlined_call_operand.vmem [shape: f32[1,4,1], index: 2, kind: input, shape index: {}]   ;;  %s324_s3 = inlined_call_operand.hbm [shape: f32[2,4,256], index: 3, kind: output, shape index: {0}]   ;;  %s325_s4 = inlined_call_operand.vmem [shape: f32[1,4,1], index: 4, kind: output, shape index: {1}]   ;;  %s326_s5 = inlined_call_operand.vmem [shape: f32[1,4,1], index: 5, kind: output, shape index: {2}]  }
   0x1   :  { %12 = vsyncpa [#allocation4], 0  ;;  %s215_s18 = smov [#allocation2]   ;;  %s167_s22 = scalar_lea.hbm %s321_s0, 256 }
   0x2   :  { %s18_s19 = sshll.u32 %s215_s18, 4  ;;  %p168_p0 = scmp.ne.s32.totalorder %s321_s0, %s167_s22  ;;  %s19_s19 = int_to_ptr.vmem [resolvable:$true] %s18_s19 }
   0x3   :  { %p171_p1 = scmp.lt.u32.totalorder %s167_s22, %s321_s0 }
   0x5   :  { %p173_p2 = pnand %p171_p1, %p168_p0 }
   0x7   :  { %176 = shalt.err (!%p173_p2)
}
   0x8   :  { %s177_s27 = scalar_lea.vmem %s19_s19, 256  ;;  %p182_p4 = scmp.lt.s32.totalorder %s19_s19, %s19_s19 }
   0x9   :  { %p178_p3 = scmp.ne.s32.totalorder %s19_s19, %s177_s27  ;;  %p183_p5 = scmp.lt.s32.totalorder %s177_s27, %s177_s27 }
   0xb   :  { %p184_p6 = por %p183_p5, %p182_p4 }
   0xd   :  { %p185_p7 = pnand %p184_p6, %p178_p3 }
   0xf   :  { %188 = shalt.err (!%p185_p7)
}
  0x10   :  { %s216_s28 = smov 128   ;;  %s217_s29 = smov 8  }
  0x11   :  { %24 = dma.hbm_to_vmem [thread:$0]  %s321_s0, 256, %s19_s19, [#allocation3], %s216_s28, %s216_s28, %s217_s29  }
  0x12   :  { %211 = dma.done.wait [#allocation3], 256  }
  0x13   :  { %212 = vsyncadd [#allocation3], 4294967040  ;;  %vm40_vm0 = vcmask 1043456   ;;  %v266_v0 = vld [vmem:[#allocation2] sm:$0xff]  ;;  %v268_v1 = vld [vmem:[#allocation2 + $0x8] sm:$0xff]  ;;  %v59_v12 = vlaneseq  ;;  %vm127_vm1 = vcmask 3072  }
  0x14   :  { %v36_v2 = vcombine.high %v266_v0, %v266_v0  ;;  %v41_v3 = vsel %vm40_vm0, %v266_v0, 0.0  ;;  %v37_v4 = vcombine.high %v268_v1, %v268_v1  ;;  %v46_v6 = vsel %vm40_vm0, %v268_v1, 0.0  ;;  %v92_v44 = vld [vmem:[%s322_s1] sm:$0xf]  ;;  %s220_s13 = smov [#allocation5]  }
  0x15   :  { %v218_v10 = vmov 839922192   ;;  %v60_v15 = vshrl.u32 %v59_v12, 7  ;;  %v219_v35 = vmov 0   ;;  %v94_v47 = vld [vmem:[%s323_s2] sm:$0xf] }
  0x16   :  { %v42_v5 = vsel %vm40_vm0, %v36_v2, 0.0  ;;  %v47_v7 = vsel %vm40_vm0, %v37_v4, 0.0  ;;  %v57_v11 = vunpack.c.l.s4 %v218_v10  ;;  %161 = vset.pattern.permute.xlu0 %v219_v35  ;;  %162 = vset.pattern.permute.xlu1 %v219_v35  ;;  %s135_s1 = sshll.u32 %s220_s13, 4  ;;  %s136_s1 = int_to_ptr.vmem [resolvable:$true] %s135_s1 }
  0x17   :  { %v43_v8 = vadd.f32 %v42_v5, %v41_v3  ;;  %v48_v9 = vadd.f32 %v47_v7, %v46_v6  ;;  %s189_s2 = scalar_lea.vmem %s136_s1, 256  ;;  %p194_p9 = scmp.lt.s32.totalorder %s136_s1, %s136_s1 }
  0x18   :  { %v58_v14 = vunpack.c.0.s8 %v57_v11  ;;  %p190_p8 = scmp.ne.s32.totalorder %s136_s1, %s189_s2  ;;  %p195_p10 = scmp.lt.s32.totalorder %s189_s2, %s189_s2 }
  0x19   :  { %44 = vadd.xlane.f32.xlu0 %v43_v8 }
  0x1a   :  { %v61_v20 = vsub.s32 %v58_v14, %v60_v15  ;;  %p196_p11 = por %p195_p10, %p194_p9 }
  0x1c   :  { %p197_p12 = pnand %p196_p11, %p190_p8 }
  0x1d   :  { %49 = vadd.xlane.f32.xlu0 %v48_v9 }
  0xa6   :  { %v45_v13 = vpop.xlane.xlu0 %44 }
  0xa7   :  { %v51_v17 = vsel %vm40_vm0, %v45_v13, 0.0 }
  0xaa   :  { %v50_v16 = vpop.xlane.xlu0 %49 }
  0xab   :  { %v52_v18 = vsel %vm40_vm0, %v50_v16, 0.0 }
  0xac   :  { %v53_v19 = vadd.f32 %v52_v18, %v51_v17 }
  0xae   :  { %v54_v21 = vmul.f32 0.001953125, %v53_v19 }
  0xb0   :  { %128 = vst.msk [vmem:[%s325_s4] sm:$0xf] %vm127_vm1, %v54_v21  ;;  %v62_v22 = vrot.slane %v54_v21, %v61_v20 }
  0xb2   :  { %v64_v23 = vsub.f32 %v266_v0, %v62_v22  ;;  %v65_v24 = vsub.f32 %v268_v1, %v62_v22 }
  0xb4   :  { %v66_v25 = vand.u32 2147483647, %v64_v23  ;;  %v67_v26 = vand.u32 2147483647, %v65_v24 }
  0xb6   :  { %v70_v27 = vcombine.high %v66_v25, %v66_v25  ;;  %v71_v28 = vcombine.high %v67_v26, %v67_v26  ;;  %v74_v29 = vsel %vm40_vm0, %v66_v25, 0.0  ;;  %v79_v33 = vsel %vm40_vm0, %v67_v26, 0.0 }
  0xb8   :  { %v75_v30 = vsel %vm40_vm0, %v70_v27, 0.0  ;;  %v80_v32 = vsel %vm40_vm0, %v71_v28, 0.0 }
  0xb9   :  { %v76_v31 = vadd.f32 %v75_v30, %v74_v29  ;;  %v81_v34 = vadd.f32 %v80_v32, %v79_v33 }
  0xbb   :  { %77 = vadd.xlane.f32.xlu1 %v76_v31 }
  0xbf   :  { %82 = vadd.xlane.f32.xlu1 %v81_v34 }
 0x148   :  { %v78_v36 = vpop.xlane.xlu1 %77 }
 0x149   :  { %v84_v38 = vsel %vm40_vm0, %v78_v36, 0.0 }
 0x14c   :  { %v83_v37 = vpop.xlane.xlu1 %82 }
 0x14d   :  { %v85_v39 = vsel %vm40_vm0, %v83_v37, 0.0 }
 0x14e   :  { %v86_v40 = vadd.f32 %v85_v39, %v84_v38 }
 0x150   :  { %v87_v41 = vmul.f32 0.001953125, %v86_v40 }
 0x152   :  { %v88_v42 = vmul.f32 1.2533141, %v87_v41 }
 0x154   :  { %v89_v43 = vadd.f32 1e-07, %v88_v42 }
 0x156   :  { %165 = vrcp.f32 %v89_v43 }
 0x160   :  { %v166_v45 = vpop.eup %165 }
 0x161   :  { %129 = vst.msk [vmem:[%s326_s5] sm:$0xf] %vm127_vm1, %v166_v45  ;;  %v93_v46 = vmul.f32 %v166_v45, %v92_v44 }
 0x163   :  { %99 = vperm.xlu0 %161, %v93_v46   ;;  %v95_v48 = vmul.f32 %v93_v46, %v54_v21 }
 0x165   :  { %v96_v49 = vsub.f32 %v94_v47, %v95_v48 }
 0x167   :  { %113 = vperm.xlu1 %162, %v96_v49  }
 0x1e2   :  { %v100_v50 = vpop.permute.xlu0 %99 }
 0x1e3   :  { %v107_v51 = vrot.slane %v100_v50, %v61_v20 }
 0x1e5   :  { %v109_v53 = vmul.f32 %v107_v51, %v266_v0  ;;  %v110_v54 = vmul.f32 %v107_v51, %v268_v1 }
 0x1e6   :  { %v114_v52 = vpop.permute.xlu1 %113 }
 0x1e7   :  { %v121_v55 = vrot.slane %v114_v52, %v61_v20 }
 0x1e9   :  { %v123_v56 = vadd.f32 %v121_v55, %v109_v53  ;;  %v124_v57 = vadd.f32 %v121_v55, %v110_v54 }
 0x1eb   :  { %125 = vst [vmem:[#allocation5] sm:$0xff] %v123_v56  ;;  %126 = vst [vmem:[#allocation5 + $0x8] sm:$0xff] %v124_v57 }
 0x1ec   :  { %200 = shalt.err (!%p197_p12)
}
 0x1ed   :  { %s201_s15 = scalar_lea.hbm %s324_s3, 256 }
 0x1ee   :  { %p202_p13 = scmp.ne.s32.totalorder %s324_s3, %s201_s15  ;;  %p205_p0 = scmp.lt.u32.totalorder %s201_s15, %s324_s3 }
 0x1f0   :  { %p207_p1 = pnand %p205_p0, %p202_p13 }
 0x1f2   :  { %210 = shalt.err (!%p207_p1)
}
 0x1f3   :  { %141 = dma.vmem_to_hbm [thread:$0]  %s136_s1, 256, %s324_s3, [#allocation4], %s216_s28, %s216_s28, %s217_s29  }
 0x1f4   :  { %213 = dma.done.wait [#allocation4], 256  }
 0x1f5   :  { %214 = vsyncadd [#allocation4], 4294967040 }
 0x1f6   :  { %153 = vsyncpa [#allocation3], 1 }
 0x1f7   :  { %154 = vsyncpa [#allocation4], 1 }

</bundles_post_ra>
